<compile_context>
chip_gen: v7x
topology: tpu7x:2x2x1
jax: 0.10.0
libtpu: 0.0.40
codegen_flags: <defaults>
</compile_context>

<pallas_src>
import functools

import jax
import jax.numpy as jnp
from jax.experimental import pallas as pl
from jax.experimental.pallas import tpu as pltpu


# ---------------------------------------------------------------------------
# Kernel
# ---------------------------------------------------------------------------
def embnet_kernel(idx_ref, ptab_ref, out_ref, *, num_classes, v_pad):
    idx = idx_ref[...]                         # (TB, S) int32 token ids
    TB, S = idx.shape
    K, CP = ptab_ref.shape                     # (S*Vp, CP) bf16 folded table
    assert K == S * v_pad

    # --- gather + linear (+ bias), folded into one bf16 MXU matmul ---
    # onehot[t, s*Vp + v] = (idx[t, s] == v); table row s*Vp + v = ptab[s, v, :]
    # => logits[t, c] = sum_s ptab[s, idx[t, s], c]  (bias folded into s=0 rows)
    iota_v = jax.lax.broadcasted_iota(jnp.int32, (TB, v_pad), 1)   # hoisted
    onehots = [
        (iota_v == idx[:, s:s + 1]).astype(jnp.bfloat16)           # (TB, Vp) exact
        for s in range(S)                                          # static unroll
    ]
    onehot = jnp.concatenate(onehots, axis=1)                      # (TB, S*Vp) lane concat
    logits = jnp.dot(onehot, ptab_ref[...],
                     preferred_element_type=jnp.float32)           # (TB, CP) f32 acc

    # --- log_softmax over the first `num_classes` lanes only ---
    lane = jax.lax.broadcasted_iota(jnp.int32, (TB, CP), 1)
    valid = lane < num_classes
    masked = jnp.where(valid, logits, -1e30)                       # exclude padded lanes
    m = jnp.max(masked, axis=-1, keepdims=True)
    shifted = masked - m
    lse = jnp.log(jnp.sum(jnp.where(valid, jnp.exp(shifted), 0.0),
                          axis=-1, keepdims=True))
    out_ref[...] = shifted - lse                                   # lane-dense (TB, CP) store


# ---------------------------------------------------------------------------
# One-time weight preprocessing (hoisted out of the per-call forward)
# ---------------------------------------------------------------------------
def fold_embnet_weights(emb_table, w, b, *, v_pad=128, c_pad=128,
                        dtype=jnp.bfloat16):
    """Fold Embedding + Linear (+ bias) into one flattened per-position table.

    emb_table: (V, E) f32, w: (C, S*E) f32 (PyTorch Linear layout), b: (C,) f32
    Returns ptab_flat: (S * v_pad, c_pad) in `dtype`, where
      ptab_flat[s*v_pad + v, c] = sum_e emb_table[v, e] * w[c, s*E + e]  (+ b[c] at s==0)
    """
    V, E = emb_table.shape
    C, H2 = w.shape
    assert H2 % E == 0, "fc input dim must be a multiple of the embedding dim"
    S = H2 // E
    assert V <= v_pad and C <= c_pad

    w3 = w.reshape(C, S, E)
    ptab = jnp.einsum("ve,cse->svc", emb_table, w3)                # (S, V, C) f32
    ptab = ptab.at[0].add(b[None, :])                              # fold bias (picked once)
    ptab = jnp.pad(ptab, ((0, 0), (0, v_pad - V), (0, c_pad - C)))  # align K and lanes
    return ptab.reshape(S * v_pad, c_pad).astype(dtype)            # (S*Vp, CP)


# ---------------------------------------------------------------------------
# Forward wrapper
# ---------------------------------------------------------------------------
def _round_up(x, m):
    return (x + m - 1) // m * m


def _pick_tb(batch, tb_max=256):
    """Batch tile: large enough to fill the MXU / amortize per-step overhead,
    but not over-padding tiny batches, and keeping >= 2 blocks when possible
    so both v7x TensorCores get work."""
    b8 = _round_up(batch, 8)
    tb = min(tb_max, b8)
    if b8 > 8 and pl.cdiv(b8, tb) < 2:
        tb = max(8, _round_up((b8 + 1) // 2, 8))
    return tb


def embnet_forward(x_idx, ptab_flat, *, num_classes=3, v_pad=128, tb=256):
    """x_idx: (B, S) int32, ptab_flat: (S*v_pad, c_pad) from fold_embnet_weights."""
    B, S = x_idx.shape
    K, CP = ptab_flat.shape
    assert K == S * v_pad, "folded table does not match sequence length / v_pad"

    tb = _pick_tb(B, tb)
    n_blocks = pl.cdiv(B, tb)
    B_pad = n_blocks * tb
    x_pad = jnp.pad(x_idx, ((0, B_pad - B), (0, 0)))               # token 0 = valid dummy

    out = pl.pallas_call(
        functools.partial(embnet_kernel, num_classes=num_classes, v_pad=v_pad),
        out_shape=jax.ShapeDtypeStruct((B_pad, CP), jnp.float32),
        grid_spec=pltpu.PrefetchScalarGridSpec(
            num_scalar_prefetch=0,
            grid=(n_blocks,),
            in_specs=[
                pl.BlockSpec((tb, S), lambda i: (i, 0)),           # indices: tiled over B
                pl.BlockSpec((K, CP), lambda i: (0, 0)),           # folded table: resident
            ],
            out_specs=pl.BlockSpec((tb, CP), lambda i: (i, 0)),    # lane-dense output slab
        ),
        compiler_params=pltpu.CompilerParams(
            dimension_semantics=("parallel",),                     # megacore over batch
            vmem_limit_bytes=32 * 1024 * 1024,
        ),
    )(x_pad, ptab_flat)

    return out[:B, :num_classes]


# ---------------------------------------------------------------------------
# Pure-JAX reference matching the PyTorch forward
# ---------------------------------------------------------------------------
def embnet_reference(x_idx, emb_table, w, b):
    embeds = emb_table[x_idx].reshape(x_idx.shape[0], -1)          # (B, S*E)
    logits = embeds @ w.T + b                                      # (B, 3)
    return jax.nn.log_softmax(logits, axis=-1)


if __name__ == "__main__":
    key = jax.random.PRNGKey(0)
    k1, k2, k3, k4 = jax.random.split(key, 4)

    # Shapes consistent with the module:
    #   emb_size = V = 100, hidden_size1 = E = 8, seq = S = 8
    #   => flattened dim = hidden_size2 = S * E = 64, out classes = 3
    B, S = 2, 8
    V, E = 100, 8
    H2 = S * E
    C = 3

    x = jax.random.randint(k1, (B, S), 0, V, dtype=jnp.int32)
    emb_table = jax.random.normal(k2, (V, E), dtype=jnp.float32)
    w = jax.random.normal(k3, (C, H2), dtype=jnp.float32) * 0.1    # PyTorch Linear layout
    b = jax.random.normal(k4, (C,), dtype=jnp.float32) * 0.1

    # One-time weight preprocessing (off the per-call critical path).
    ptab_flat = fold_embnet_weights(emb_table, w, b)

    out = embnet_forward(x, ptab_flat, num_classes=C)
    jax.block_until_ready(out)

    ref = embnet_reference(x, emb_table, w, b)
    assert out.shape == (B, C)
    # bf16 folded table adds ~2^-9 relative quantization on top of the f32
    # reassociation from folding the Linear into the table.
    assert jnp.allclose(out, ref, atol=3e-2, rtol=3e-2), "mismatch vs reference"

    print("KERNEL_OK")
</pallas_src>

<mosaic_0001>
module attributes {stable_mosaic.version = 11 : i64} {
  func.func @embnet_kernel(%arg0: i32, %arg1: memref<8x8xi32, #tpu.memory_space<vmem>>, %arg2: memref<1024x128xbf16, #tpu.memory_space<vmem>>, %arg3: memref<8x128xf32, #tpu.memory_space<vmem>>) attributes {dimension_semantics = [#tpu.dimension_semantics<parallel>], iteration_bounds = array<i64: 1>, scalar_prefetch = 0 : i64, scratch_operands = 0 : i64, tpu.core_type = #tpu.core_type<tc>, window_params = [{transform_indices = @transform_0, window_bounds = array<i64: 8, 8>}, {pipeline_mode = #tpu.pipeline_mode<synchronous>, transform_indices = @transform_1, window_bounds = array<i64: 1024, 128>}, {transform_indices = @transform_2, window_bounds = array<i64: 8, 128>}]} {
    %c0 = arith.constant 0 : index
    %c0_0 = arith.constant 0 : index
    %0 = vector.load %arg1[%c0, %c0_0] : memref<8x8xi32, #tpu.memory_space<vmem>>, vector<8x8xi32>
    %1 = tpu.iota {dimensions = array<i32: 1>} : vector<8x128xi32>
    %2 = vector.extract_strided_slice %0 {offsets = [0, 0], sizes = [8, 1], strides = [1, 1]} : vector<8x8xi32> to vector<8x1xi32>
    %3 = vector.broadcast %2 : vector<8x1xi32> to vector<8x128xi32>
    %4 = arith.cmpi eq, %1, %3 : vector<8x128xi32>
    %5 = arith.extui %4 : vector<8x128xi1> to vector<8x128xi32>
    %6 = arith.sitofp %5 : vector<8x128xi32> to vector<8x128xf32>
    %7 = arith.truncf %6 : vector<8x128xf32> to vector<8x128xbf16>
    %8 = vector.extract_strided_slice %0 {offsets = [0, 1], sizes = [8, 1], strides = [1, 1]} : vector<8x8xi32> to vector<8x1xi32>
    %9 = vector.broadcast %8 : vector<8x1xi32> to vector<8x128xi32>
    %10 = arith.cmpi eq, %1, %9 : vector<8x128xi32>
    %11 = arith.extui %10 : vector<8x128xi1> to vector<8x128xi32>
    %12 = arith.sitofp %11 : vector<8x128xi32> to vector<8x128xf32>
    %13 = arith.truncf %12 : vector<8x128xf32> to vector<8x128xbf16>
    %14 = vector.extract_strided_slice %0 {offsets = [0, 2], sizes = [8, 1], strides = [1, 1]} : vector<8x8xi32> to vector<8x1xi32>
    %15 = vector.broadcast %14 : vector<8x1xi32> to vector<8x128xi32>
    %16 = arith.cmpi eq, %1, %15 : vector<8x128xi32>
    %17 = arith.extui %16 : vector<8x128xi1> to vector<8x128xi32>
    %18 = arith.sitofp %17 : vector<8x128xi32> to vector<8x128xf32>
    %19 = arith.truncf %18 : vector<8x128xf32> to vector<8x128xbf16>
    %20 = vector.extract_strided_slice %0 {offsets = [0, 3], sizes = [8, 1], strides = [1, 1]} : vector<8x8xi32> to vector<8x1xi32>
    %21 = vector.broadcast %20 : vector<8x1xi32> to vector<8x128xi32>
    %22 = arith.cmpi eq, %1, %21 : vector<8x128xi32>
    %23 = arith.extui %22 : vector<8x128xi1> to vector<8x128xi32>
    %24 = arith.sitofp %23 : vector<8x128xi32> to vector<8x128xf32>
    %25 = arith.truncf %24 : vector<8x128xf32> to vector<8x128xbf16>
    %26 = vector.extract_strided_slice %0 {offsets = [0, 4], sizes = [8, 1], strides = [1, 1]} : vector<8x8xi32> to vector<8x1xi32>
    %27 = vector.broadcast %26 : vector<8x1xi32> to vector<8x128xi32>
    %28 = arith.cmpi eq, %1, %27 : vector<8x128xi32>
    %29 = arith.extui %28 : vector<8x128xi1> to vector<8x128xi32>
    %30 = arith.sitofp %29 : vector<8x128xi32> to vector<8x128xf32>
    %31 = arith.truncf %30 : vector<8x128xf32> to vector<8x128xbf16>
    %32 = vector.extract_strided_slice %0 {offsets = [0, 5], sizes = [8, 1], strides = [1, 1]} : vector<8x8xi32> to vector<8x1xi32>
    %33 = vector.broadcast %32 : vector<8x1xi32> to vector<8x128xi32>
    %34 = arith.cmpi eq, %1, %33 : vector<8x128xi32>
    %35 = arith.extui %34 : vector<8x128xi1> to vector<8x128xi32>
    %36 = arith.sitofp %35 : vector<8x128xi32> to vector<8x128xf32>
    %37 = arith.truncf %36 : vector<8x128xf32> to vector<8x128xbf16>
    %38 = vector.extract_strided_slice %0 {offsets = [0, 6], sizes = [8, 1], strides = [1, 1]} : vector<8x8xi32> to vector<8x1xi32>
    %39 = vector.broadcast %38 : vector<8x1xi32> to vector<8x128xi32>
    %40 = arith.cmpi eq, %1, %39 : vector<8x128xi32>
    %41 = arith.extui %40 : vector<8x128xi1> to vector<8x128xi32>
    %42 = arith.sitofp %41 : vector<8x128xi32> to vector<8x128xf32>
    %43 = arith.truncf %42 : vector<8x128xf32> to vector<8x128xbf16>
    %44 = vector.extract_strided_slice %0 {offsets = [0, 7], sizes = [8, 1], strides = [1, 1]} : vector<8x8xi32> to vector<8x1xi32>
    %45 = vector.broadcast %44 : vector<8x1xi32> to vector<8x128xi32>
    %46 = arith.cmpi eq, %1, %45 : vector<8x128xi32>
    %47 = arith.extui %46 : vector<8x128xi1> to vector<8x128xi32>
    %48 = arith.sitofp %47 : vector<8x128xi32> to vector<8x128xf32>
    %49 = arith.truncf %48 : vector<8x128xf32> to vector<8x128xbf16>
    %50 = tpu.concatenate %7, %13, %19, %25, %31, %37, %43, %49 in 1 : vector<8x128xbf16>, vector<8x128xbf16>, vector<8x128xbf16>, vector<8x128xbf16>, vector<8x128xbf16>, vector<8x128xbf16>, vector<8x128xbf16>, vector<8x128xbf16> -> vector<8x1024xbf16>
    %c0_1 = arith.constant 0 : index
    %c0_2 = arith.constant 0 : index
    %51 = vector.load %arg2[%c0_1, %c0_2] : memref<1024x128xbf16, #tpu.memory_space<vmem>>, vector<1024x128xbf16>
    %cst = arith.constant dense<0.000000e+00> : vector<8x128xf32>
    %52 = tpu.matmul %50, %51, %cst {dimension_numbers = #tpu.dot_dimension_numbers<[1], [0], [0], [1], [0, 0, 1, 1], [], []>} : vector<8x1024xbf16>, vector<1024x128xbf16>, vector<8x128xf32> -> vector<8x128xf32>
    %53 = tpu.iota {dimensions = array<i32: 1>} : vector<8x128xi32>
    %c3_i32 = arith.constant 3 : i32
    %54 = vector.broadcast %c3_i32 : i32 to vector<8x128xi32>
    %55 = arith.cmpi slt, %53, %54 : vector<8x128xi32>
    %cst_3 = arith.constant -1.000000e+30 : f32
    %56 = vector.broadcast %cst_3 : f32 to vector<8x128xf32>
    %57 = arith.select %55, %52, %56 : vector<8x128xi1>, vector<8x128xf32>
    %cst_4 = arith.constant dense<0xFF800000> : vector<8xf32>
    %58 = vector.multi_reduction <maximumf>, %57, %cst_4 [1] : vector<8x128xf32> to vector<8xf32>
    %59 = vector.shape_cast %58 : vector<8xf32> to vector<8x1xf32>
    %60 = vector.broadcast %59 : vector<8x1xf32> to vector<8x128xf32>
    %61 = arith.subf %57, %60 : vector<8x128xf32>
    %62 = math.exp %61 : vector<8x128xf32>
    %cst_5 = arith.constant 0.000000e+00 : f32
    %63 = vector.broadcast %cst_5 : f32 to vector<8x128xf32>
    %64 = arith.select %55, %62, %63 : vector<8x128xi1>, vector<8x128xf32>
    %cst_6 = arith.constant dense<0.000000e+00> : vector<8xf32>
    %65 = vector.multi_reduction <add>, %64, %cst_6 [1] : vector<8x128xf32> to vector<8xf32>
    %66 = vector.shape_cast %65 : vector<8xf32> to vector<8x1xf32>
    %67 = math.log %66 : vector<8x1xf32>
    %68 = vector.broadcast %67 : vector<8x1xf32> to vector<8x128xf32>
    %69 = arith.subf %61, %68 : vector<8x128xf32>
    %c0_7 = arith.constant 0 : index
    %c0_8 = arith.constant 0 : index
    %70 = vector.load %arg3[%c0_7, %c0_8] : memref<8x128xf32, #tpu.memory_space<vmem>>, vector<8x128xf32>
    tpu.vector_store %arg3[%c0_7, %c0_8], %69 {strides = array<i32>} : memref<8x128xf32, #tpu.memory_space<vmem>>, vector<8x128xf32>,
    return
  }
  func.func @transform_0(%arg0: i32) -> (i32, i32) {
    %c0_i32 = arith.constant 0 : i32
    %c0_i32_0 = arith.constant 0 : i32
    return %arg0, %c0_i32 : i32, i32
  }
  func.func @transform_1(%arg0: i32) -> (i32, i32) {
    %c0_i32 = arith.constant 0 : i32
    %c0_i32_0 = arith.constant 0 : i32
    %c0_i32_1 = arith.constant 0 : i32
    return %c0_i32, %c0_i32_0 : i32, i32
  }
  func.func @transform_2(%arg0: i32) -> (i32, i32) {
    %c0_i32 = arith.constant 0 : i32
    %c0_i32_0 = arith.constant 0 : i32
    return %arg0, %c0_i32 : i32, i32
  }
}

</mosaic_0001>

<bundles_post_ra>
// kernel: tpu_custom_call.1
= control target key start
LH: loop header
LB: loop body
LE: loop exit
PB: predicated region body
PF: predicated region fallthrough
CT: control target
= control target key end

     0   :  { %7 = vsyncpa [#allocation3], 0  ;;  %s1230_s0 = inlined_call_operand.hbm [shape: s32[8,8], index: 0, kind: input, shape index: {}]   ;;  %s1231_s1 = inlined_call_operand.hbm [shape: bf16[1024,128], index: 1, kind: input, shape index: {}]   ;;  %s1232_s2 = inlined_call_operand.hbm [shape: f32[8,128], index: 2, kind: output, shape index: {}]  }
   0x1   :  { %8 = vsyncpa [#allocation6], 0 }
   0x2   :  { %9 = vsyncpa [#allocation4], 0  ;;  %s1139_s9 = smov [#allocation2]   ;;  %s1140_s11 = smov [#allocation5]  }
   0x3   :  { %s16_s10 = sshll.u32 %s1139_s9, 4  ;;  %s25_s12 = sshll.u32 %s1140_s11, 4  ;;  %s17_s10 = int_to_ptr.vmem [resolvable:$true] %s16_s10  ;;  %s1168_s12 = int_to_ptr.vmem [resolvable:$true] %s25_s12 }
   0x4   :  { %s1067_s15 = scalar_lea.hbm %s1230_s0, 128 }
   0x5   :  { %p1068_p0 = scmp.ne.s32.totalorder %s1230_s0, %s1067_s15  ;;  %p1071_p1 = scmp.lt.u32.totalorder %s1067_s15, %s1230_s0 }
   0x7   :  { %p1073_p2 = pnand %p1071_p1, %p1068_p0 }
   0x9   :  { %1076 = shalt.err (!%p1073_p2)
}
   0xa   :  { %s1077_s20 = scalar_lea.vmem %s17_s10, 128  ;;  %p1082_p4 = scmp.lt.s32.totalorder %s17_s10, %s17_s10 }
   0xb   :  { %p1078_p3 = scmp.ne.s32.totalorder %s17_s10, %s1077_s20  ;;  %p1083_p5 = scmp.lt.s32.totalorder %s1077_s20, %s1077_s20 }
   0xd   :  { %p1084_p6 = por %p1083_p5, %p1082_p4 }
   0xf   :  { %p1085_p7 = pnand %p1084_p6, %p1078_p3 }
  0x11   :  { %1088 = shalt.err (!%p1085_p7)
}
  0x12   :  { %19 = dma.hbm_to_vmem [thread:$0]  %s1230_s0, 128, %s17_s10, [#allocation3]  }
  0x13   :  { %s1089_s25 = scalar_lea.hbm %s1231_s1, 8192 }
  0x14   :  { %p1090_p8 = scmp.ne.s32.totalorder %s1231_s1, %s1089_s25  ;;  %p1093_p9 = scmp.lt.u32.totalorder %s1089_s25, %s1231_s1 }
  0x16   :  { %p1095_p10 = pnand %p1093_p9, %p1090_p8 }
  0x18   :  { %1098 = shalt.err (!%p1095_p10)
}
  0x19   :  { %s1099_s30 = scalar_lea.vmem %s1168_s12, 8192  ;;  %p1104_p12 = scmp.lt.s32.totalorder %s1168_s12, %s1168_s12 }
  0x1a   :  { %p1100_p11 = scmp.ne.s32.totalorder %s1168_s12, %s1099_s30  ;;  %p1105_p13 = scmp.lt.s32.totalorder %s1099_s30, %s1099_s30 }
  0x1c   :  { %p1106_p0 = por %p1105_p13, %p1104_p12 }
  0x1e   :  { %p1107_p1 = pnand %p1106_p0, %p1100_p11 }
  0x20   :  { %1110 = shalt.err (!%p1107_p1)
}
  0x21   :  { %s1141_s0 = smov 64   ;;  %s1142_s3 = smov 4  }
  0x22   :  { %31 = dma.hbm_to_vmem [thread:$0]  %s1231_s1, 8192, %s1168_s12, [#allocation6], %s1141_s0, %s1141_s0, %s1142_s3  }
  0x23   :  { %1133 = dma.done.wait [#allocation3], 128  }
  0x24   :  { %1134 = vsyncadd [#allocation3], 4294967168 }
  0x25   :  { %1135 = dma.done.wait [#allocation6], 8192  }
  0x26   :  { %1136 = vsyncadd [#allocation6], 4294959104  ;;  %v1143_v0 = vmov 3   ;;  %v1144_v1 = vmov 1   ;;  %v39_v2 = vld [vmem:[#allocation2] sm:$0xff]  ;;  %v999_v3 = vld [vmem:[#allocation5 + $0x40] sm:$0xff]   ;;  %v40_v43 = vlaneseq }
  0x27   :  { %992 = vset.pattern.permute.xlu1 %v1143_v0  ;;  %990 = vset.pattern.permute.xlu0 %v1144_v1  ;;  %v1000_v4 = vld [vmem:[#allocation5 + $0xc0] sm:$0xff]   ;;  %v1145_v7 = vmov 2   ;;  %v1146_v8 = vmov 0   ;;  %v1003_v9 = vld [vmem:[#allocation5 + $0x48] sm:$0xff]   ;;  %v1007_v13 = vld [vmem:[#allocation5 + $0x50] sm:$0xff]   ;;  %v1147_v14 = vmov 5  }
  0x28   :  { %64 = vperm.xlu1 %992, %v39_v2   ;;  %50 = vperm.xlu0 %990, %v39_v2   ;;  %v1001_v5 = vld [vmem:[#allocation5] sm:$0xff]   ;;  %v1004_v10 = vld [vmem:[#allocation5 + $0xc8] sm:$0xff]   ;;  %v1148_v15 = vmov 4   ;;  %v1008_v16 = vld [vmem:[#allocation5 + $0xd0] sm:$0xff]   ;;  %v1149_v21 = vmov 7   ;;  %v1150_v27 = vmov 6  }
  0x29   :  { %888 = vmatprep.subr.bf16.mxu0 %v999_v3  ;;  %910 = vmatprep.subr.bf16.mxu1 %v1000_v4  ;;  %v1002_v6 = vld [vmem:[#allocation5 + $0x80] sm:$0xff]   ;;  %v1005_v11 = vld [vmem:[#allocation5 + $0x8] sm:$0xff]   ;;  %v1009_v17 = vld [vmem:[#allocation5 + $0x10] sm:$0xff]   ;;  %v1199_v44 = vand.u32 127, %v40_v43  ;;  %v1151_v47 = vmov 1.0|1.0  }
  0x2a   :  { %889 = vmatpush3.bf16.msra.mxu0 %v1001_v5  ;;  %911 = vmatpush3.bf16.msra.mxu1 %v1002_v6  ;;  %v1006_v12 = vld [vmem:[#allocation5 + $0x88] sm:$0xff]   ;;  %v1010_v18 = vld [vmem:[#allocation5 + $0x90] sm:$0xff]   ;;  %v1011_v19 = vld [vmem:[#allocation5 + $0x58] sm:$0xff]   ;;  %s1152_s1 = smov [#allocation7]  }
  0x2b   :  { %890 = vmatprep.subr.bf16.mxu0 %v1003_v9  ;;  %912 = vmatprep.subr.bf16.mxu1 %v1004_v10  ;;  %v1012_v20 = vld [vmem:[#allocation5 + $0xd8] sm:$0xff]   ;;  %v1015_v24 = vld [vmem:[#allocation5 + $0x60] sm:$0xff]   ;;  %v1019_v29 = vld [vmem:[#allocation5 + $0x68] sm:$0xff]   ;;  %s790_s6 = sshll.u32 %s1152_s1, 4  ;;  %s791_s6 = int_to_ptr.vmem [resolvable:$true] %s790_s6 }
  0x2c   :  { %993 = vset.pattern.permute.xlu1 %v1145_v7  ;;  %991 = vset.pattern.permute.xlu0 %v1146_v8  ;;  %v1013_v22 = vld [vmem:[#allocation5 + $0x18] sm:$0xff]   ;;  %v1016_v25 = vld [vmem:[#allocation5 + $0xe0] sm:$0xff]   ;;  %v1020_v30 = vld [vmem:[#allocation5 + $0xe8] sm:$0xff]   ;;  %s1111_s7 = scalar_lea.vmem %s791_s6, 128  ;;  %p1116_p3 = scmp.lt.s32.totalorder %s791_s6, %s791_s6 }
  0x2d   :  { %57 = vperm.xlu1 %993, %v39_v2   ;;  %43 = vperm.xlu0 %991, %v39_v2   ;;  %v1014_v23 = vld [vmem:[#allocation5 + $0x98] sm:$0xff]   ;;  %v1017_v26 = vld [vmem:[#allocation5 + $0x20] sm:$0xff]   ;;  %v1021_v31 = vld [vmem:[#allocation5 + $0x28] sm:$0xff]   ;;  %p1112_p2 = scmp.ne.s32.totalorder %s791_s6, %s1111_s7  ;;  %p1117_p4 = scmp.lt.s32.totalorder %s1111_s7, %s1111_s7 }
  0x2e   :  { %891 = vmatpush3.bf16.msra.mxu0 %v1005_v11  ;;  %913 = vmatpush3.bf16.msra.mxu1 %v1006_v12  ;;  %v1018_v28 = vld [vmem:[#allocation5 + $0xa0] sm:$0xff]   ;;  %v1022_v32 = vld [vmem:[#allocation5 + $0xa8] sm:$0xff]   ;;  %v1023_v33 = vld [vmem:[#allocation5 + $0x70] sm:$0xff]  }
  0x2f   :  { %892 = vmatprep.subr.bf16.mxu0 %v1007_v13  ;;  %914 = vmatprep.subr.bf16.mxu1 %v1008_v16  ;;  %v1024_v34 = vld [vmem:[#allocation5 + $0xf0] sm:$0xff]   ;;  %v1027_v37 = vld [vmem:[#allocation5 + $0x78] sm:$0xff]   ;;  %v1031_v41 = vld [vmem:[#allocation5 + $0x140] sm:$0xff]   ;;  %p1118_p5 = por %p1117_p4, %p1116_p3 }
  0x30   :  { %v1025_v35 = vld [vmem:[#allocation5 + $0x30] sm:$0xff]   ;;  %v1028_v38 = vld [vmem:[#allocation5 + $0xf8] sm:$0xff]   ;;  %v1032_v42 = vld [vmem:[#allocation5 + $0x1c0] sm:$0xff]  }
  0x31   :  { %994 = vset.pattern.permute.xlu1 %v1147_v14  ;;  %995 = vset.pattern.permute.xlu0 %v1148_v15  ;;  %v1026_v36 = vld [vmem:[#allocation5 + $0xb0] sm:$0xff]   ;;  %v1029_v39 = vld [vmem:[#allocation5 + $0x38] sm:$0xff]   ;;  %v1034_v50 = vld [vmem:[#allocation5 + $0x180] sm:$0xff]   ;;  %p1119_p6 = pnand %p1118_p5, %p1112_p2 }
  0x32   :  { %78 = vperm.xlu1 %994, %v39_v2   ;;  %71 = vperm.xlu0 %995, %v39_v2   ;;  %v1030_v40 = vld [vmem:[#allocation5 + $0xb8] sm:$0xff]   ;;  %v1033_v51 = vld [vmem:[#allocation5 + $0x100] sm:$0xff]   ;;  %v1036_v52 = vld [vmem:[#allocation5 + $0x1c8] sm:$0xff]  }
  0x33   :  { %893 = vmatpush3.bf16.msra.mxu0 %v1009_v17  ;;  %915 = vmatpush3.bf16.msra.mxu1 %v1010_v18  ;;  %v1035_v53 = vld [vmem:[#allocation5 + $0x148] sm:$0xff]   ;;  %v1040_v56 = vld [vmem:[#allocation5 + $0x1d0] sm:$0xff]   ;;  %v1044_v61 = vld [vmem:[#allocation5 + $0x1d8] sm:$0xff]  }
  0x34   :  { %894 = vmatprep.subr.bf16.mxu0 %v1011_v19  ;;  %916 = vmatprep.subr.bf16.mxu1 %v1012_v20  ;;  %v1038_v54 = vld [vmem:[#allocation5 + $0x188] sm:$0xff]   ;;  %v1039_v58 = vld [vmem:[#allocation5 + $0x150] sm:$0xff]   ;;  %v1043_v62 = vld [vmem:[#allocation5 + $0x158] sm:$0xff]  }
  0x35   :  { %v1037_v55 = vld [vmem:[#allocation5 + $0x108] sm:$0xff]   ;;  %v1042_v59 = vld [vmem:[#allocation5 + $0x190] sm:$0xff]   ;;  %v1046_v0 = vld [vmem:[#allocation5 + $0x198] sm:$0xff]  }
  0x36   :  { %996 = vset.pattern.permute.xlu1 %v1149_v21  ;;  %998 = vset.pattern.permute.xlu0 %v1149_v21  ;;  %v1041_v60 = vld [vmem:[#allocation5 + $0x110] sm:$0xff]   ;;  %v1045_v1 = vld [vmem:[#allocation5 + $0x118] sm:$0xff]   ;;  %v1047_v3 = vld [vmem:[#allocation5 + $0x160] sm:$0xff]  }
  0x37   :  { %92 = vperm.xlu1 %996, %v39_v2   ;;  %895 = vmatpush3.bf16.msra.mxu0 %v1013_v22  ;;  %v1050_v4 = vld [vmem:[#allocation5 + $0x1a0] sm:$0xff]   ;;  %v1052_v6 = vld [vmem:[#allocation5 + $0x1e8] sm:$0xff]   ;;  %v1056_v10 = vld [vmem:[#allocation5 + $0x1f0] sm:$0xff]  }
  0x38   :  { %917 = vmatpush3.bf16.msra.mxu1 %v1014_v23  ;;  %896 = vmatprep.subr.bf16.mxu0 %v1015_v24  ;;  %v1049_v5 = vld [vmem:[#allocation5 + $0x120] sm:$0xff]   ;;  %v1051_v7 = vld [vmem:[#allocation5 + $0x168] sm:$0xff]   ;;  %v1055_v11 = vld [vmem:[#allocation5 + $0x170] sm:$0xff]  }
  0x39   :  { %918 = vmatprep.subr.bf16.mxu1 %v1016_v25  ;;  %v1053_v8 = vld [vmem:[#allocation5 + $0x1a8] sm:$0xff]   ;;  %v1057_v12 = vld [vmem:[#allocation5 + $0x1b0] sm:$0xff]   ;;  %v1060_v14 = vld [vmem:[#allocation5 + $0x1f8] sm:$0xff]  }
  0x3a   :  { %v1054_v9 = vld [vmem:[#allocation5 + $0x128] sm:$0xff]   ;;  %v1058_v13 = vld [vmem:[#allocation5 + $0x130] sm:$0xff]   ;;  %v1059_v15 = vld [vmem:[#allocation5 + $0x178] sm:$0xff]  }
  0x3b   :  { %997 = vset.pattern.permute.xlu1 %v1150_v27  ;;  %897 = vmatpush3.bf16.msra.mxu0 %v1017_v26  ;;  %v1061_v18 = vld [vmem:[#allocation5 + $0x1b8] sm:$0xff]  }
  0x3c   :  { %85 = vperm.xlu1 %997, %v39_v2   ;;  %919 = vmatpush3.bf16.msra.mxu1 %v1018_v28  ;;  %v1048_v2 = vld [vmem:[#allocation5 + $0x1e0] sm:$0xff]   ;;  %v1062_v19 = vld [vmem:[#allocation5 + $0x138] sm:$0xff]  }
  0x3d   :  { %898 = vmatprep.subr.bf16.mxu0 %v1019_v29  ;;  %920 = vmatprep.subr.bf16.mxu1 %v1020_v30 }
  0x3f   :  { %899 = vmatpush3.bf16.msra.mxu0 %v1021_v31 }
  0x40   :  { %921 = vmatpush3.bf16.msra.mxu1 %v1022_v32  ;;  %900 = vmatprep.subr.bf16.mxu0 %v1023_v33 }
  0x41   :  { %922 = vmatprep.subr.bf16.mxu1 %v1024_v34 }
  0x43   :  { %901 = vmatpush3.bf16.msra.mxu0 %v1025_v35 }
  0x44   :  { %923 = vmatpush3.bf16.msra.mxu1 %v1026_v36  ;;  %902 = vmatprep.subr.bf16.mxu0 %v1027_v37 }
  0x45   :  { %924 = vmatprep.subr.bf16.mxu1 %v1028_v38 }
  0x47   :  { %903 = vmatpush3.bf16.msra.mxu0 %v1029_v39 }
  0x48   :  { %925 = vmatpush3.bf16.msra.mxu1 %v1030_v40  ;;  %932 = vmatprep.subr.bf16.mxu0 %v1031_v41 }
  0x49   :  { %954 = vmatprep.subr.bf16.mxu1 %v1032_v42 }
  0xa7   :  { %v51_v45 = vpop.permute.xlu0 %50  ;;  %v65_v46 = vpop.permute.xlu1 %64 }
  0xa8   :  { %vm52_vm0 = vcmp.eq.s32.totalorder %v1199_v44, %v51_v45  ;;  %vm66_vm1 = vcmp.eq.s32.totalorder %v1199_v44, %v65_v46 }
  0xa9   :  { %vm872_vm2 = vmpackc.low %vm52_vm0, %vm52_vm0  ;;  %vm770_vm0 = vcmp.lt.s32.totalorder %v1199_v44, 3 }
  0xaa   :  { %873 = vmatprep.mubr.msk.bf16.mxu0 %vm872_vm2, %v1151_v47  ;;  %vm876_vm3 = vmpackc.low %vm66_vm1, %vm66_vm1 }
  0xab   :  { %877 = vmatprep.mubr.msk.bf16.mxu1 %vm876_vm3, %v1151_v47 }
  0xac   :  { %v58_v48 = vpop.permute.xlu1 %57  ;;  %v44_v49 = vpop.permute.xlu0 %43 }
  0xad   :  { %vm59_vm4 = vcmp.eq.s32.totalorder %v1199_v44, %v58_v48  ;;  %vm45_vm5 = vcmp.eq.s32.totalorder %v1199_v44, %v44_v49 }
  0xae   :  { %vm878_vm6 = vmpackc.low %vm59_vm4, %vm59_vm4 }
  0xaf   :  { %vm874_vm7 = vmpackc.low %vm45_vm5, %vm45_vm5  ;;  %879 = vmatmul.mubr.msk.bf16.vlgmr.msra.gmra.mrb[0].mxu1 %vm878_vm6, %v1151_v47 }
  0xb0   :  { %875 = vmatmul.mubr.msk.bf16.vlgmr.msra.gmra.mrb[0].mxu0 %vm874_vm7, %v1151_v47  ;;  %955 = vmatpush3.bf16.msra.mxu1 %v1034_v50 }
  0xb1   :  { %933 = vmatpush3.bf16.msra.mxu0 %v1033_v51  ;;  %956 = vmatprep.subr.bf16.mxu1 %v1036_v52  ;;  %v79_v57 = vpop.permute.xlu1 %78  ;;  %v72_v17 = vpop.permute.xlu0 %71 }
  0xb2   :  { %934 = vmatprep.subr.bf16.mxu0 %v1035_v53  ;;  %vm80_vm8 = vcmp.eq.s32.totalorder %v1199_v44, %v79_v57  ;;  %vm73_vm13 = vcmp.eq.s32.totalorder %v1199_v44, %v72_v17 }
  0xb3   :  { %vm880_vm9 = vmpackc.low %vm80_vm8, %vm80_vm8 }
  0xb4   :  { %957 = vmatpush3.bf16.msra.mxu1 %v1038_v54  ;;  %881 = vmatprep.mubr.msk.bf16.mxu0 %vm880_vm9, %v1151_v47  ;;  %vm882_vm15 = vmpackc.low %vm73_vm13, %vm73_vm13 }
  0xb5   :  { %935 = vmatpush3.bf16.msra.mxu0 %v1037_v55  ;;  %958 = vmatprep.subr.bf16.mxu1 %v1040_v56 }
  0xb6   :  { %936 = vmatprep.subr.bf16.mxu0 %v1039_v58  ;;  %v93_v63 = vpop.permute.xlu1 %92 }
  0xb7   :  { %vm94_vm10 = vcmp.eq.s32.totalorder %v1199_v44, %v93_v63 }
  0xb8   :  { %959 = vmatpush3.bf16.msra.mxu1 %v1042_v59  ;;  %vm884_vm11 = vmpackc.low %vm94_vm10, %vm94_vm10 }
  0xb9   :  { %937 = vmatpush3.bf16.msra.mxu0 %v1041_v60  ;;  %960 = vmatprep.subr.bf16.mxu1 %v1044_v61 }
  0xba   :  { %938 = vmatprep.subr.bf16.mxu0 %v1043_v62  ;;  %885 = vmatprep.mubr.msk.bf16.mxu1 %vm884_vm11, %v1151_v47 }
  0xbb   :  { %v86_v16 = vpop.permute.xlu1 %85 }
  0xbc   :  { %961 = vmatpush3.bf16.msra.mxu1 %v1046_v0  ;;  %vm87_vm12 = vcmp.eq.s32.totalorder %v1199_v44, %v86_v16 }
  0xbd   :  { %939 = vmatpush3.bf16.msra.mxu0 %v1045_v1  ;;  %962 = vmatprep.subr.bf16.mxu1 %v1048_v2  ;;  %vm886_vm14 = vmpackc.low %vm87_vm12, %vm87_vm12 }
  0xbe   :  { %940 = vmatprep.subr.bf16.mxu0 %v1047_v3 }
  0xc0   :  { %963 = vmatpush3.bf16.msra.mxu1 %v1050_v4 }
  0xc1   :  { %941 = vmatpush3.bf16.msra.mxu0 %v1049_v5  ;;  %964 = vmatprep.subr.bf16.mxu1 %v1052_v6 }
  0xc2   :  { %942 = vmatprep.subr.bf16.mxu0 %v1051_v7 }
  0xc4   :  { %965 = vmatpush3.bf16.msra.mxu1 %v1053_v8 }
  0xc5   :  { %943 = vmatpush3.bf16.msra.mxu0 %v1054_v9  ;;  %966 = vmatprep.subr.bf16.mxu1 %v1056_v10 }
  0xc6   :  { %944 = vmatprep.subr.bf16.mxu0 %v1055_v11 }
  0xc8   :  { %967 = vmatpush3.bf16.msra.mxu1 %v1057_v12 }
  0xc9   :  { %945 = vmatpush3.bf16.msra.mxu0 %v1058_v13  ;;  %968 = vmatprep.subr.bf16.mxu1 %v1060_v14 }
  0xca   :  { %946 = vmatprep.subr.bf16.mxu0 %v1059_v15 }
  0xcc   :  { %969 = vmatpush3.bf16.msra.mxu1 %v1061_v18 }
  0xcd   :  { %947 = vmatpush3.bf16.msra.mxu0 %v1062_v19 }
  0xcf   :  { %887 = vmatmul.mubr.msk.bf16.vlgmr.msra.gmra.mrb[4].mxu1 %vm886_vm14, %v1151_v47 }
  0xd0   :  { %883 = vmatmul.mubr.msk.bf16.vlgmr.msra.gmra.mrb[4].mxu0 %vm882_vm15, %v1151_v47 }
 0x182   :  { %v926_v20 = vpop.f32.mrb[0].mxu1 }
 0x183   :  { %v904_v21 = vpop.f32.mrb[0].mxu0  ;;  %v927_v22 = vpop.f32.mrb[1].mxu1 }
 0x184   :  { %v905_v23 = vpop.f32.mrb[1].mxu0  ;;  %v928_v24 = vadd.f32 %v927_v22, %v926_v20  ;;  %v929_v25 = vpop.f32.mrb[2].mxu1 }
 0x185   :  { %v906_v26 = vadd.f32 %v905_v23, %v904_v21  ;;  %v907_v27 = vpop.f32.mrb[2].mxu0  ;;  %v930_v28 = vpop.f32.mrb[3].mxu1 }
 0x186   :  { %v908_v29 = vpop.f32.mrb[3].mxu0 }
 0x187   :  { %v685_v30 = vadd.f32 %v928_v24, %v906_v26 }
 0x1a2   :  { %v970_v31 = vpop.f32.mrb[4].mxu1 }
 0x1a3   :  { %v948_v32 = vpop.f32.mrb[4].mxu0  ;;  %v971_v33 = vpop.f32.mrb[5].mxu1 }
 0x1a4   :  { %v949_v34 = vpop.f32.mrb[5].mxu0  ;;  %v972_v35 = vadd.f32 %v971_v33, %v970_v31  ;;  %v973_v36 = vpop.f32.mrb[6].mxu1 }
 0x1a5   :  { %v950_v37 = vadd.f32 %v949_v34, %v948_v32  ;;  %v951_v38 = vpop.f32.mrb[6].mxu0  ;;  %v974_v39 = vpop.f32.mrb[7].mxu1 }
 0x1a6   :  { %v952_v40 = vpop.f32.mrb[7].mxu0 }
 0x1a7   :  { %v725_v41 = vadd.f32 %v950_v37, %v685_v30 }
 0x1a9   :  { %v765_v42 = vadd.f32 %v972_v35, %v725_v41 }
 0x1ab   :  { %v771_v43 = vsel %vm770_vm0, %v765_v42, -1e+30 }
 0x1ac   :  { %772 = vmax.xlane.f32.xlu0 %v771_v43 }
 0x239   :  { %v773_v45 = vpop.xlane.xlu0 %772 }
 0x23a   :  { %v774_v46 = vsub.f32 %v771_v43, %v773_v45 }
 0x23c   :  { %v775_v47 = vmul.f32 1.442695, %v774_v46 }
 0x23e   :  { %1063 = vpow2.f32 %v775_v47 }
 0x248   :  { %v1064_v48 = vpop.eup %1063 }
 0x249   :  { %v777_v49 = vsel %vm770_vm0, %v1064_v48, 0.0 }
 0x24a   :  { %778 = vadd.xlane.f32.xlu1 %v777_v49 }
 0x2d7   :  { %v779_v50 = vpop.xlane.xlu1 %778 }
 0x2d8   :  { %1065 = vlog2.f32 %v779_v50 }
 0x2e2   :  { %v1066_v51 = vpop.eup %1065 }
 0x2e3   :  { %v781_v52 = vmul.f32 0.6931472, %v1066_v51 }
 0x2e5   :  { %v782_v53 = vsub.f32 %v774_v46, %v781_v52 }
 0x2e7   :  { %783 = vst [vmem:[#allocation7] sm:$0xff] %v782_v53 }
 0x2e8   :  { %1122 = shalt.err (!%p1119_p6)
}
 0x2e9   :  { %s1123_s10 = scalar_lea.hbm %s1232_s2, 128 }
 0x2ea   :  { %p1124_p7 = scmp.ne.s32.totalorder %s1232_s2, %s1123_s10  ;;  %p1127_p8 = scmp.lt.u32.totalorder %s1123_s10, %s1232_s2 }
 0x2ec   :  { %p1129_p9 = pnand %p1127_p8, %p1124_p7 }
 0x2ee   :  { %1132 = shalt.err (!%p1129_p9)
}
 0x2ef   :  { %793 = dma.vmem_to_hbm [thread:$0]  %s791_s6, 128, %s1232_s2, [#allocation4]  }
 0x2f0   :  { %1137 = dma.done.wait [#allocation4], 128  }
 0x2f1   :  { %1138 = vsyncadd [#allocation4], 4294967168 }
 0x2f2   :  { %797 = vsyncpa [#allocation3], 1 }
 0x2f3   :  { %798 = vsyncpa [#allocation6], 1 }
 0x2f4   :  { %799 = vsyncpa [#allocation4], 1 }

</bundles_post_ra>
